<compile_context>
chip_gen: v5e
topology: v5e:2x2
jax: 0.10.0
libtpu: 0.0.40
codegen_flags: <defaults>
</compile_context>

<pallas_src>
import jax
import jax.numpy as jnp
import numpy as np
from jax.experimental import pallas as pl
from jax.experimental.pallas import tpu as pltpu


def _fused_gate_gemm_kernel(lhs_ref, rhs_ref, out_ref):
    # One MXU pass: (B*C_out, Kp) x (Kp, DHW) -> (B*C_out, DHW).
    # Linear term, conv term and bias are all folded into the contraction
    # (block-diagonal LHS + bias column), so no extra VPU adds are needed.
    out_ref[...] = jnp.dot(
        lhs_ref[...], rhs_ref[...], preferred_element_type=jnp.float32
    ).astype(out_ref.dtype)


def lstm_gate3d_forward(encoder_out, h, w_lin, w_conv, bias, output_shape):
    """Pallas equivalent of LSTMGate3D.forward.

    encoder_out: (B, fan_in) f32
    h          : (B, C_in, D, H, W) f32 (NCDHW)
    w_lin      : (C_out*D*H*W, fan_in)   -- nn.Linear weight (bias=False)
    w_conv     : (C_out, C_in, k, k, k)  -- nn.Conv3d weight (bias=False)
    bias       : (C_out,)                -- the (1, C, 1, 1, 1) parameter, squeezed
    returns    : (B, C_out, D, H, W) f32
    """
    B, fan_in = encoder_out.shape
    _, C_out, D, H, W = output_shape
    C_in = h.shape[1]
    k = w_conv.shape[-1]
    pad = (k - 1) // 2
    DHW = D * H * W
    kc = C_in * k ** 3

    # ---- glue: layout plumbing only (no FLOPs) ----
    # im2col patches (B, kc, DHW), column order (ci, kd, kh, kw) -- matches
    # w_conv.reshape(C_out, C_in*k^3).
    h_pad = jnp.pad(h, ((0, 0), (0, 0), (pad, pad), (pad, pad), (pad, pad)))
    slices = [h_pad[:, :, kd:kd + D, kh:kh + H, kw:kw + W]
              for kd in range(k) for kh in range(k) for kw in range(k)]
    patches = jnp.stack(slices, axis=2).reshape(B, kc, DHW)

    K_lin = C_out * fan_in          # linear contraction, per output channel
    K_conv = B * kc                 # conv contraction, per batch
    K_used = K_lin + K_conv + 1     # +1 column carries the bias
    K_pad = ((K_used + 127) // 128) * 128
    R = B * C_out                   # output rows, b-major / c-minor (== .view(-1,C,D,H,W))

    # LHS (R, K_pad): row r = b*C_out + c holds
    #   enc[b]      at columns [c*fan_in, (c+1)*fan_in)
    #   w_conv[c]   at columns [K_lin + b*kc, K_lin + (b+1)*kc)
    #   bias[c]     at column  K_lin + K_conv
    # and zeros elsewhere (block-diagonal packing).
    eye_c = jnp.eye(C_out, dtype=jnp.float32)
    eye_b = jnp.eye(B, dtype=jnp.float32)
    enc_blk = jnp.einsum('bf,cd->bcdf', encoder_out, eye_c).reshape(R, K_lin)
    wconv_flat = w_conv.reshape(C_out, kc)
    conv_blk = jnp.einsum('ck,bd->bcdk', wconv_flat, eye_b).reshape(R, K_conv)
    bias_col = jnp.tile(bias.reshape(1, C_out), (B, 1)).reshape(R, 1)
    lhs = jnp.concatenate(
        [enc_blk, conv_blk, bias_col,
         jnp.zeros((R, K_pad - K_used), jnp.float32)], axis=1)

    # RHS (K_pad, DHW):
    #   rows [0, K_lin)                : w_lin rearranged so row (c*fan_in + f),
    #                                    col s equals w_lin[c*DHW + s, f]
    #   rows [K_lin, K_lin + K_conv)   : patches[b, j, :] at row K_lin + b*kc + j
    #   row  K_lin + K_conv            : ones (bias)
    #   remaining rows                 : zeros (padding, result-neutral)
    wlin_rhs = jnp.transpose(
        w_lin.reshape(C_out, DHW, fan_in), (0, 2, 1)).reshape(K_lin, DHW)
    pat_rhs = patches.reshape(K_conv, DHW)
    ones_row = jnp.ones((1, DHW), jnp.float32)
    rhs = jnp.concatenate(
        [wlin_rhs, pat_rhs, ones_row,
         jnp.zeros((K_pad - K_used, DHW), jnp.float32)], axis=0)

    out = pl.pallas_call(
        _fused_gate_gemm_kernel,
        out_shape=jax.ShapeDtypeStruct((R, DHW), jnp.float32),
        in_specs=[
            pl.BlockSpec(memory_space=pltpu.MemorySpace.VMEM),  # lhs (R, K_pad)
            pl.BlockSpec(memory_space=pltpu.MemorySpace.VMEM),  # rhs (K_pad, DHW)
        ],
        out_specs=pl.BlockSpec(memory_space=pltpu.MemorySpace.VMEM),
    )(lhs, rhs)

    return out.reshape(B, C_out, D, H, W)


if __name__ == "__main__":
    # Small shapes consistent with the module:
    #   fan_in=32, filter_params=(C_in=4, C_out=4, k=3), output_shape=(B,4,4,8,8)
    B, fan_in = 2, 32
    C_in, C_out, k = 4, 4, 3
    D, H, W = 4, 8, 8
    output_shape = (B, C_out, D, H, W)

    key = jax.random.PRNGKey(0)
    k1, k2, k3, k4 = jax.random.split(key, 4)
    encoder_out = jax.random.normal(k1, (B, fan_in), jnp.float32)
    h = jax.random.normal(k2, (B, C_in, D, H, W), jnp.float32)
    # Deterministic parameter init (synthetic, no checkpoint load).
    w_lin = 0.05 * jax.random.normal(k3, (C_out * D * H * W, fan_in), jnp.float32)
    w_conv = 0.05 * jax.random.normal(k4, (C_out, C_in, k, k, k), jnp.float32)
    bias = jnp.full((C_out,), 0.1, jnp.float32)  # torch FloatTensor(1,C,1,1,1).fill_(0.1)

    out = lstm_gate3d_forward(encoder_out, h, w_lin, w_conv, bias, output_shape)
    out = jax.block_until_ready(out)

    # Pure-JAX reference for verification.
    lin_ref = (encoder_out @ w_lin.T).reshape(B, C_out, D, H, W)
    conv_ref = jax.lax.conv_general_dilated(
        h, w_conv, window_strides=(1, 1, 1),
        padding=[((k - 1) // 2, (k - 1) // 2)] * 3,
        dimension_numbers=("NCDHW", "OIDHW", "NCDHW"))
    expected = lin_ref + conv_ref + bias.reshape(1, C_out, 1, 1, 1)

    assert out.shape == (B, C_out, D, H, W)
    np.testing.assert_allclose(np.asarray(out), np.asarray(expected),
                               rtol=1e-4, atol=1e-4)
    print("KERNEL_OK")
</pallas_src>

<mosaic_0001>
module attributes {stable_mosaic.version = 11 : i64} {
  func.func @_fused_gate_gemm_kernel(%arg0: memref<8x384xf32, #tpu.memory_space<vmem>>, %arg1: memref<384x256xf32, #tpu.memory_space<vmem>>, %arg2: memref<8x256xf32, #tpu.memory_space<vmem>>) attributes {dimension_semantics = [], scalar_prefetch = 0 : i64, scratch_operands = 0 : i64, tpu.core_type = #tpu.core_type<tc>} {
    %c0 = arith.constant 0 : index
    %c0_0 = arith.constant 0 : index
    %0 = vector.load %arg0[%c0, %c0_0] : memref<8x384xf32, #tpu.memory_space<vmem>>, vector<8x384xf32>
    %c0_1 = arith.constant 0 : index
    %c0_2 = arith.constant 0 : index
    %1 = vector.load %arg1[%c0_1, %c0_2] : memref<384x256xf32, #tpu.memory_space<vmem>>, vector<384x256xf32>
    %cst = arith.constant dense<0.000000e+00> : vector<8x256xf32>
    %2 = tpu.matmul %0, %1, %cst {dimension_numbers = #tpu.dot_dimension_numbers<[1], [0], [0], [1], [0, 0, 1, 1], [], []>} : vector<8x384xf32>, vector<384x256xf32>, vector<8x256xf32> -> vector<8x256xf32>
    %c0_3 = arith.constant 0 : index
    %c0_4 = arith.constant 0 : index
    %3 = vector.load %arg2[%c0_3, %c0_4] : memref<8x256xf32, #tpu.memory_space<vmem>>, vector<8x256xf32>
    tpu.vector_store %arg2[%c0_3, %c0_4], %2 {strides = array<i32>} : memref<8x256xf32, #tpu.memory_space<vmem>>, vector<8x256xf32>,
    return
  }
}

</mosaic_0001>

<bundles_post_ra>
// kernel: tpu_custom_call.1
= control target key start
LH: loop header
LB: loop body
LE: loop exit
PB: predicated region body
PF: predicated region fallthrough
CT: control target
= control target key end

     0   :  { %7 = vsyncpa [#allocation3], 0  ;;  %s393_s0 = inlined_call_operand.hbm [shape: f32[8,384], index: 0, kind: input, shape index: {}]   ;;  %s394_s1 = inlined_call_operand.hbm [shape: f32[384,256], index: 1, kind: input, shape index: {}]   ;;  %s395_s2 = inlined_call_operand.hbm [shape: f32[8,256], index: 2, kind: output, shape index: {}]  }
   0x1   :  { %8 = vsyncpa [#allocation6], 0 }
   0x2   :  { %9 = vsyncpa [#allocation4], 0  ;;  %s15_s11 = sshll.u32 %s393_s0, 4  ;;  %s364_s12 = smov [#allocation2]   ;;  %s16_s11 = int_to_ptr.hbm [resolvable:$true] %s15_s11 }
   0x3   :  { %s17_s13 = sshll.u32 %s364_s12, 4  ;;  %s25_s16 = sshll.u32 %s394_s1, 4  ;;  %s18_s13 = int_to_ptr.vmem [resolvable:$true] %s17_s13  ;;  %s26_s16 = int_to_ptr.hbm [resolvable:$true] %s25_s16 }
   0x4   :  { %20 = dma.hbm_to_vmem [thread:$0]  %s16_s11, 384, %s18_s13, [#allocation3]  }
   0x5   :  { %s365_s17 = smov [#allocation5]   ;;  %s366_s19 = smov 256  }
   0x6   :  { %s27_s18 = sshll.u32 %s365_s17, 4  ;;  %s367_s20 = smov 16   ;;  %s28_s18 = int_to_ptr.vmem [resolvable:$true] %s27_s18 }
   0x7   :  { %33 = dma.hbm_to_vmem [thread:$0]  %s26_s16, 12288, %s28_s18, [#allocation6], %s366_s19, %s366_s19, %s367_s20  }
   0x8   :  { %358 = dma.done.wait [#allocation3], 384  }
   0x9   :  { %359 = vsyncadd [#allocation3], 4294966912 }
   0xa   :  { %360 = dma.done.wait [#allocation6], 12288  }
   0xb   :  { %361 = vsyncadd [#allocation6], 4294955008  ;;  %v75_v0 = vld [vmem:[#allocation5 + $0xf0] sm:$0xff]  ;;  %v73_v1 = vld [vmem:[#allocation5 + $0xe0] sm:$0xff]  ;;  %s368_s0 = smov [#allocation7]   ;;  %s270_s23 = sshll.u32 %s395_s2, 4  ;;  %s271_s23 = int_to_ptr.hbm [resolvable:$true] %s270_s23 }
   0xc   :  { %v107_v2 = vld [vmem:[#allocation5 + $0x1f0] sm:$0xff]  ;;  %141 = vmatpush.msra.mxu0 %v75_v0  ;;  %v105_v3 = vld [vmem:[#allocation5 + $0x1e0] sm:$0xff]  ;;  %v76_v15 = vld [vmem:[#allocation5 + $0xf8] sm:$0xff]  ;;  %s268_s1 = sshll.u32 %s368_s0, 4  ;;  %s269_s1 = int_to_ptr.vmem [resolvable:$true] %s268_s1 }
   0xd   :  { %161 = vmatpush.msra.mxu1 %v107_v2  ;;  %v71_v4 = vld [vmem:[#allocation5 + $0xd0] sm:$0xff]  ;;  %v69_v6 = vld [vmem:[#allocation5 + $0xc0] sm:$0xff]  ;;  %201 = vmatpush.msra.mxu3 %v76_v15  ;;  %v74_v19 = vld [vmem:[#allocation5 + $0xe8] sm:$0xff] }
   0xe   :  { %v103_v5 = vld [vmem:[#allocation5 + $0x1d0] sm:$0xff]  ;;  %142 = vmatpush.msra.mxu0 %v73_v1  ;;  %v101_v7 = vld [vmem:[#allocation5 + $0x1c0] sm:$0xff]  ;;  %v72_v22 = vld [vmem:[#allocation5 + $0xd8] sm:$0xff] }
   0xf   :  { %162 = vmatpush.msra.mxu1 %v105_v3  ;;  %v67_v8 = vld [vmem:[#allocation5 + $0xb0] sm:$0xff]  ;;  %v137_v11 = vld [vmem:[#allocation5 + $0x2e0] sm:$0xff]  ;;  %202 = vmatpush.msra.mxu3 %v74_v19  ;;  %v70_v24 = vld [vmem:[#allocation5 + $0xc8] sm:$0xff] }
  0x10   :  { %143 = vmatpush.msra.mxu0 %v71_v4  ;;  %v99_v9 = vld [vmem:[#allocation5 + $0x1b0] sm:$0xff]  ;;  %v65_v12 = vld [vmem:[#allocation5 + $0xa0] sm:$0xff]  ;;  %v68_v28 = vld [vmem:[#allocation5 + $0xb8] sm:$0xff] }
  0x11   :  { %163 = vmatpush.msra.mxu1 %v103_v5  ;;  %v139_v10 = vld [vmem:[#allocation5 + $0x2f0] sm:$0xff]  ;;  %v97_v13 = vld [vmem:[#allocation5 + $0x1a0] sm:$0xff]  ;;  %203 = vmatpush.msra.mxu3 %v72_v22  ;;  %v66_v32 = vld [vmem:[#allocation5 + $0xa8] sm:$0xff] }
  0x12   :  { %144 = vmatpush.msra.mxu0 %v69_v6  ;;  %181 = vmatpush.msra.mxu2 %v139_v10  ;;  %v135_v14 = vld [vmem:[#allocation5 + $0x2d0] sm:$0xff]  ;;  %v133_v18 = vld [vmem:[#allocation5 + $0x2c0] sm:$0xff]  ;;  %v64_v36 = vld [vmem:[#allocation5 + $0x98] sm:$0xff] }
  0x13   :  { %164 = vmatpush.msra.mxu1 %v101_v7  ;;  %v63_v16 = vld [vmem:[#allocation5 + $0x90] sm:$0xff]  ;;  %v61_v20 = vld [vmem:[#allocation5 + $0x80] sm:$0xff]  ;;  %204 = vmatpush.msra.mxu3 %v70_v24  ;;  %v62_v40 = vld [vmem:[#allocation5 + $0x88] sm:$0xff] }
  0x14   :  { %145 = vmatpush.msra.mxu0 %v67_v8  ;;  %v95_v17 = vld [vmem:[#allocation5 + $0x190] sm:$0xff]  ;;  %182 = vmatpush.msra.mxu2 %v137_v11  ;;  %v93_v21 = vld [vmem:[#allocation5 + $0x180] sm:$0xff]  ;;  %v60_v44 = vld [vmem:[#allocation5 + $0x78] sm:$0xff] }
  0x15   :  { %165 = vmatpush.msra.mxu1 %v99_v9  ;;  %v131_v23 = vld [vmem:[#allocation5 + $0x2b0] sm:$0xff]  ;;  %v129_v27 = vld [vmem:[#allocation5 + $0x2a0] sm:$0xff]  ;;  %205 = vmatpush.msra.mxu3 %v68_v28  ;;  %v58_v48 = vld [vmem:[#allocation5 + $0x68] sm:$0xff] }
  0x16   :  { %146 = vmatpush.msra.mxu0 %v65_v12  ;;  %183 = vmatpush.msra.mxu2 %v135_v14  ;;  %v59_v25 = vld [vmem:[#allocation5 + $0x70] sm:$0xff]  ;;  %v57_v29 = vld [vmem:[#allocation5 + $0x60] sm:$0xff]  ;;  %v56_v52 = vld [vmem:[#allocation5 + $0x58] sm:$0xff] }
  0x17   :  { %166 = vmatpush.msra.mxu1 %v97_v13  ;;  %v91_v26 = vld [vmem:[#allocation5 + $0x170] sm:$0xff]  ;;  %v89_v30 = vld [vmem:[#allocation5 + $0x160] sm:$0xff]  ;;  %206 = vmatpush.msra.mxu3 %v66_v32  ;;  %v108_v55 = vld [vmem:[#allocation5 + $0x1f8] sm:$0xff] }
  0x18   :  { %147 = vmatpush.msra.mxu0 %v63_v16  ;;  %184 = vmatpush.msra.mxu2 %v133_v18  ;;  %v127_v31 = vld [vmem:[#allocation5 + $0x290] sm:$0xff]  ;;  %v125_v35 = vld [vmem:[#allocation5 + $0x280] sm:$0xff]  ;;  %v140_v56 = vld [vmem:[#allocation5 + $0x2f8] sm:$0xff] }
  0x19   :  { %167 = vmatpush.msra.mxu1 %v95_v17  ;;  %v55_v33 = vld [vmem:[#allocation5 + $0x50] sm:$0xff]  ;;  %v53_v37 = vld [vmem:[#allocation5 + $0x40] sm:$0xff]  ;;  %207 = vmatpush.msra.mxu3 %v64_v36  ;;  %v54_v58 = vld [vmem:[#allocation5 + $0x48] sm:$0xff] }
  0x1a   :  { %148 = vmatpush.msra.mxu0 %v61_v20  ;;  %185 = vmatpush.msra.mxu2 %v131_v23  ;;  %v87_v34 = vld [vmem:[#allocation5 + $0x150] sm:$0xff]  ;;  %v85_v38 = vld [vmem:[#allocation5 + $0x140] sm:$0xff]  ;;  %v106_v59 = vld [vmem:[#allocation5 + $0x1e8] sm:$0xff] }
  0x1b   :  { %168 = vmatpush.msra.mxu1 %v93_v21  ;;  %v123_v39 = vld [vmem:[#allocation5 + $0x270] sm:$0xff]  ;;  %v121_v43 = vld [vmem:[#allocation5 + $0x260] sm:$0xff]  ;;  %208 = vmatpush.msra.mxu3 %v62_v40  ;;  %v138_v60 = vld [vmem:[#allocation5 + $0x2e8] sm:$0xff] }
  0x1c   :  { %149 = vmatpush.msra.mxu0 %v59_v25  ;;  %186 = vmatpush.msra.mxu2 %v129_v27  ;;  %v51_v41 = vld [vmem:[#allocation5 + $0x30] sm:$0xff]  ;;  %v49_v45 = vld [vmem:[#allocation5 + $0x20] sm:$0xff]  ;;  %v52_v62 = vld [vmem:[#allocation5 + $0x38] sm:$0xff] }
  0x1d   :  { %169 = vmatpush.msra.mxu1 %v91_v26  ;;  %v83_v42 = vld [vmem:[#allocation5 + $0x130] sm:$0xff]  ;;  %v81_v46 = vld [vmem:[#allocation5 + $0x120] sm:$0xff]  ;;  %209 = vmatpush.msra.mxu3 %v60_v44  ;;  %v104_v63 = vld [vmem:[#allocation5 + $0x1d8] sm:$0xff] }
  0x1e   :  { %150 = vmatpush.msra.mxu0 %v57_v29  ;;  %187 = vmatpush.msra.mxu2 %v127_v31  ;;  %v119_v47 = vld [vmem:[#allocation5 + $0x250] sm:$0xff]  ;;  %v117_v51 = vld [vmem:[#allocation5 + $0x240] sm:$0xff]  ;;  %v136_v0 = vld [vmem:[#allocation5 + $0x2d8] sm:$0xff] }
  0x1f   :  { %170 = vmatpush.msra.mxu1 %v89_v30  ;;  %v47_v49 = vld [vmem:[#allocation5 + $0x10] sm:$0xff]  ;;  %v45_v53 = vld [vmem:[#allocation5] sm:$0xff]  ;;  %210 = vmatpush.msra.mxu3 %v58_v48  ;;  %v50_v2 = vld [vmem:[#allocation5 + $0x28] sm:$0xff] }
  0x20   :  { %151 = vmatpush.msra.mxu0 %v55_v33  ;;  %188 = vmatpush.msra.mxu2 %v125_v35  ;;  %v79_v50 = vld [vmem:[#allocation5 + $0x110] sm:$0xff]  ;;  %v77_v54 = vld [vmem:[#allocation5 + $0x100] sm:$0xff]  ;;  %v102_v3 = vld [vmem:[#allocation5 + $0x1c8] sm:$0xff] }
  0x21   :  { %171 = vmatpush.msra.mxu1 %v87_v34  ;;  %v115_v57 = vld [vmem:[#allocation5 + $0x230] sm:$0xff]  ;;  %211 = vmatpush.msra.mxu3 %v56_v52  ;;  %v113_v61 = vld [vmem:[#allocation5 + $0x220] sm:$0xff]  ;;  %v134_v4 = vld [vmem:[#allocation5 + $0x2c8] sm:$0xff] }
  0x22   :  { %152 = vmatpush.msra.mxu0 %v53_v37  ;;  %189 = vmatpush.msra.mxu2 %v123_v39  ;;  %v111_v1 = vld [vmem:[#allocation5 + $0x210] sm:$0xff]  ;;  %v109_v5 = vld [vmem:[#allocation5 + $0x200] sm:$0xff]  ;;  %v48_v6 = vld [vmem:[#allocation5 + $0x18] sm:$0xff] }
  0x23   :  { %172 = vmatpush.msra.mxu1 %v85_v38  ;;  %212 = vmatpush.msra.mxu3 %v54_v58  ;;  %v100_v7 = vld [vmem:[#allocation5 + $0x1b8] sm:$0xff]  ;;  %v42_v10 = vld [vmem:[#allocation2] sm:$0xff]  ;;  %v43_v13 = vld [vmem:[#allocation2 + $0x8] sm:$0xff] }
  0x24   :  { %153 = vmatpush.msra.mxu0 %v51_v41  ;;  %190 = vmatpush.msra.mxu2 %v121_v43  ;;  %v132_v8 = vld [vmem:[#allocation5 + $0x2b8] sm:$0xff]  ;;  %v98_v11 = vld [vmem:[#allocation5 + $0x1a8] sm:$0xff] }
  0x25   :  { %173 = vmatpush.msra.mxu1 %v83_v42  ;;  %213 = vmatpush.msra.mxu3 %v52_v62  ;;  %v44_v9 = vld [vmem:[#allocation2 + $0x10] sm:$0xff]  ;;  %v130_v12 = vld [vmem:[#allocation5 + $0x2a8] sm:$0xff] }
  0x26   :  { %154 = vmatpush.msra.mxu0 %v49_v45  ;;  %191 = vmatpush.msra.mxu2 %v119_v47  ;;  %v46_v14 = vld [vmem:[#allocation5 + $0x8] sm:$0xff]  ;;  %v96_v15 = vld [vmem:[#allocation5 + $0x198] sm:$0xff] }
  0x27   :  { %174 = vmatpush.msra.mxu1 %v81_v46  ;;  %214 = vmatpush.msra.mxu3 %v50_v2  ;;  %v128_v16 = vld [vmem:[#allocation5 + $0x298] sm:$0xff]  ;;  %v94_v17 = vld [vmem:[#allocation5 + $0x188] sm:$0xff] }
  0x28   :  { %155 = vmatpush.msra.mxu0 %v47_v49  ;;  %192 = vmatpush.msra.mxu2 %v117_v51  ;;  %v126_v18 = vld [vmem:[#allocation5 + $0x288] sm:$0xff]  ;;  %v92_v19 = vld [vmem:[#allocation5 + $0x178] sm:$0xff] }
  0x29   :  { %175 = vmatpush.msra.mxu1 %v79_v50  ;;  %215 = vmatpush.msra.mxu3 %v48_v6  ;;  %v124_v20 = vld [vmem:[#allocation5 + $0x278] sm:$0xff]  ;;  %v90_v21 = vld [vmem:[#allocation5 + $0x168] sm:$0xff] }
  0x2a   :  { %156 = vmatpush.msra.mxu0 %v45_v53  ;;  %193 = vmatpush.msra.mxu2 %v115_v57  ;;  %v122_v22 = vld [vmem:[#allocation5 + $0x268] sm:$0xff]  ;;  %v88_v23 = vld [vmem:[#allocation5 + $0x158] sm:$0xff] }
  0x2b   :  { %176 = vmatpush.msra.mxu1 %v77_v54  ;;  %157 = vmatmul.f32.vlgmr.msra.gmra.mxu0 %v42_v10  ;;  %v120_v24 = vld [vmem:[#allocation5 + $0x258] sm:$0xff]  ;;  %v86_v25 = vld [vmem:[#allocation5 + $0x148] sm:$0xff] }
  0x2c   :  { %221 = vmatpush.msrb.mxu0 %v108_v55  ;;  %194 = vmatpush.msra.mxu2 %v113_v61  ;;  %v118_v26 = vld [vmem:[#allocation5 + $0x248] sm:$0xff]  ;;  %v84_v27 = vld [vmem:[#allocation5 + $0x138] sm:$0xff] }
  0x2d   :  { %241 = vmatpush.msrb.mxu1 %v140_v56  ;;  %216 = vmatpush.msra.mxu3 %v46_v14  ;;  %v116_v28 = vld [vmem:[#allocation5 + $0x238] sm:$0xff]  ;;  %v82_v29 = vld [vmem:[#allocation5 + $0x128] sm:$0xff] }
  0x2e   :  { %222 = vmatpush.msrb.mxu0 %v106_v59  ;;  %195 = vmatpush.msra.mxu2 %v111_v1  ;;  %v114_v30 = vld [vmem:[#allocation5 + $0x228] sm:$0xff]  ;;  %v80_v31 = vld [vmem:[#allocation5 + $0x118] sm:$0xff] }
  0x2f   :  { %242 = vmatpush.msrb.mxu1 %v138_v60  ;;  %217 = vmatmul.f32.vlgmr.msra.gmra.mxu3 %v42_v10  ;;  %v112_v32 = vld [vmem:[#allocation5 + $0x218] sm:$0xff]  ;;  %v78_v33 = vld [vmem:[#allocation5 + $0x108] sm:$0xff] }
  0x30   :  { %223 = vmatpush.msrb.mxu0 %v104_v63  ;;  %196 = vmatpush.msra.mxu2 %v109_v5  ;;  %v110_v34 = vld [vmem:[#allocation5 + $0x208] sm:$0xff] }
  0x31   :  { %243 = vmatpush.msrb.mxu1 %v136_v0  ;;  %197 = vmatmul.f32.vlgmr.msra.gmra.mxu2 %v44_v9 }
  0x32   :  { %224 = vmatpush.msrb.mxu0 %v102_v3  ;;  %177 = vmatmul.f32.vlgmr.msra.gmra.mxu1 %v43_v13 }
  0x33   :  { %244 = vmatpush.msrb.mxu1 %v134_v4 }
  0x34   :  { %225 = vmatpush.msrb.mxu0 %v100_v7 }
  0x35   :  { %245 = vmatpush.msrb.mxu1 %v132_v8 }
  0x36   :  { %226 = vmatpush.msrb.mxu0 %v98_v11 }
  0x37   :  { %246 = vmatpush.msrb.mxu1 %v130_v12 }
  0x38   :  { %227 = vmatpush.msrb.mxu0 %v96_v15 }
  0x39   :  { %247 = vmatpush.msrb.mxu1 %v128_v16 }
  0x3a   :  { %228 = vmatpush.msrb.mxu0 %v94_v17 }
  0x3b   :  { %248 = vmatpush.msrb.mxu1 %v126_v18 }
  0x3c   :  { %229 = vmatpush.msrb.mxu0 %v92_v19 }
  0x3d   :  { %249 = vmatpush.msrb.mxu1 %v124_v20 }
  0x3e   :  { %230 = vmatpush.msrb.mxu0 %v90_v21 }
  0x3f   :  { %250 = vmatpush.msrb.mxu1 %v122_v22 }
  0x40   :  { %231 = vmatpush.msrb.mxu0 %v88_v23 }
  0x41   :  { %251 = vmatpush.msrb.mxu1 %v120_v24 }
  0x42   :  { %232 = vmatpush.msrb.mxu0 %v86_v25 }
  0x43   :  { %252 = vmatpush.msrb.mxu1 %v118_v26 }
  0x44   :  { %233 = vmatpush.msrb.mxu0 %v84_v27 }
  0x45   :  { %253 = vmatpush.msrb.mxu1 %v116_v28 }
  0x46   :  { %234 = vmatpush.msrb.mxu0 %v82_v29 }
  0x47   :  { %254 = vmatpush.msrb.mxu1 %v114_v30 }
  0x48   :  { %235 = vmatpush.msrb.mxu0 %v80_v31 }
  0x49   :  { %255 = vmatpush.msrb.mxu1 %v112_v32 }
  0x4a   :  { %236 = vmatpush.msrb.mxu0 %v78_v33 }
  0x4b   :  { %256 = vmatpush.msrb.mxu1 %v110_v34  ;;  %237 = vmatmul.f32.vlgmr.msrb.gmra.mxu0 %v43_v13 }
  0x4c   :  { %257 = vmatmul.f32.vlgmr.msrb.gmra.mxu1 %v44_v9 }
  0xa8   :  { %v158_v35 = vpop.f32.mrf.mxu0 }
  0xaf   :  { %v178_v36 = vpop.f32.mrf.mxu1 }
  0xb0   :  { %v179_v37 = vadd.f32 %v178_v36, %v158_v35 }
  0xb2   :  { %v218_v40 = vpop.f32.mrf.mxu3 }
  0xb4   :  { %v198_v38 = vpop.f32.mrf.mxu2 }
  0xb5   :  { %v199_v39 = vadd.f32 %v198_v38, %v179_v37 }
  0xb7   :  { %261 = vst [vmem:[#allocation7] sm:$0xff] %v199_v39 }
  0xc8   :  { %v238_v41 = vpop.f32.mrf.mxu0 }
  0xc9   :  { %v258_v42 = vpop.f32.mrf.mxu1  ;;  %v239_v43 = vadd.f32 %v238_v41, %v218_v40 }
  0xcb   :  { %v259_v44 = vadd.f32 %v258_v42, %v239_v43 }
  0xcd   :  { %262 = vst [vmem:[#allocation7 + $0x8] sm:$0xff] %v259_v44 }
  0xce   :  { %273 = dma.vmem_to_hbm [thread:$0]  %s269_s1, 256, %s271_s23, [#allocation4]  }
  0xcf   :  { %362 = dma.done.wait [#allocation4], 256  }
  0xd0   :  { %363 = vsyncadd [#allocation4], 4294967040 }
  0xd1   :  { %278 = vsyncpa [#allocation3], 1 }
  0xd2   :  { %279 = vsyncpa [#allocation6], 1 }
  0xd3   :  { %280 = vsyncpa [#allocation4], 1 }

</bundles_post_ra>
